<compile_context>
chip_gen: v7x
topology: tpu7x:2x2x1
jax: 0.10.0
libtpu: 0.0.40
codegen_flags: <defaults>
</compile_context>

<pallas_src>
import jax
import jax.numpy as jnp
from jax import lax
from jax.experimental import pallas as pl
from jax.experimental.pallas import tpu as pltpu


def _make_loss_kernel(entropy_lambda: float, total_rows: int, tile_rows: int):
    # Python scalars only — inlined as literals at trace time.  (jnp.float32(...)
    # values captured by the closure are what triggered the previous compile error.)
    lam = float(entropy_lambda)
    n_valid = int(total_rows)
    tb = int(tile_rows)

    def kernel(preds_ref, targets_ref, attn_ref, out_ref):
        i = pl.program_id(0)

        logits = preds_ref[...].astype(jnp.float32)   # (TB, C)
        tgt = targets_ref[...]                        # (TB, 1) int32
        attn = attn_ref[...].astype(jnp.float32)      # (TB, S)

        # Mask padded tail rows of the last tile (if B % TB != 0).
        row_ids = i * tb + lax.broadcasted_iota(jnp.int32, (tb, 1), 0)
        valid = (row_ids < n_valid).astype(jnp.float32)                           # (TB, 1)

        # ---- cross entropy: logsumexp(row) - row[target] ----
        m = jnp.max(logits, axis=-1, keepdims=True)                               # (TB, 1)
        lse = jnp.log(jnp.sum(jnp.exp(logits - m), axis=-1, keepdims=True)) + m   # (TB, 1)
        class_ids = lax.broadcasted_iota(jnp.int32, logits.shape, 1)              # (TB, C)
        tgt_logit = jnp.sum(jnp.where(class_ids == tgt, logits, 0.0),
                            axis=-1, keepdims=True)                               # (TB, 1)
        ce = lse - tgt_logit                                                      # (TB, 1)

        # ---- attention entropy: H = am + log(Z) - sum(e * a) / Z ----
        am = jnp.max(attn, axis=-1, keepdims=True)                                # (TB, 1)
        e = jnp.exp(attn - am)                                                    # (TB, S)
        z = jnp.sum(e, axis=-1, keepdims=True)                                    # (TB, 1)
        sum_ea = jnp.sum(e * attn, axis=-1, keepdims=True)                        # (TB, 1)
        # Reciprocal is per-row only after the rewrite -> keep it exact (tolerance).
        ent = am + jnp.log(z) - sum_ea * pl.reciprocal(z, approx=False)           # (TB, 1)
        # TODO(synk): reference uses log(p + 1e-9); the identity drops the epsilon
        # (difference is O(1e-8) for non-degenerate attention rows).

        partial = jnp.sum(valid * (ce + lam * ent))        # scalar tile partial (a sum)
        out_ref[...] = jnp.broadcast_to(partial, out_ref.shape)  # lane-dense (1,8,128) store

    return kernel


def attention_entropy_min_ce_loss(preds, targets, attention_weights, entropy_lambda=1.0):
    """Pallas-backed forward. preds [B,C], targets [B] int, attention_weights [B,S]."""
    # TODO(synk): optional per-class `weight` rescaling of CrossEntropyLoss not kernelized
    # (module default weight=None is what is implemented).
    # TODO(synk): for vocab-scale C, add a class-tile grid axis with an online logsumexp;
    # here large C is handled by shrinking the batch tile instead.
    B, C = preds.shape
    S = attention_weights.shape[-1]

    # ---- batch tile: multiple of 8, sized so double-buffered inputs stay small ----
    bytes_per_row = C * preds.dtype.itemsize + S * attention_weights.dtype.itemsize + 4
    budget = 4 * 1024 * 1024                       # per buffer-set (x2 for double buffering)
    tb = max(8, min(1024, (budget // max(bytes_per_row, 1)) // 8 * 8))
    tb = min(tb, ((B + 7) // 8) * 8)               # don't exceed the (8-rounded) batch
    num_tiles = pl.cdiv(B, tb)
    b_pad = num_tiles * tb

    tgt2d = targets.reshape(B, 1).astype(jnp.int32)
    preds_p, tgt_p, attn_p = preds, tgt2d, attention_weights
    if b_pad != B:
        preds_p = jnp.pad(preds, ((0, b_pad - B), (0, 0)))
        tgt_p = jnp.pad(tgt2d, ((0, b_pad - B), (0, 0)))
        attn_p = jnp.pad(attention_weights, ((0, b_pad - B), (0, 0)))

    vmem_limit = int(min(32 * 1024 * 1024,
                         max(16 * 1024 * 1024, 2 * tb * bytes_per_row + (2 << 20))))

    cost = pl.CostEstimate(
        flops=int(8 * B * (C + S)),
        transcendentals=int(B * (C + S) + 4 * B),
        bytes_accessed=int(preds_p.size * preds_p.dtype.itemsize
                           + attn_p.size * attn_p.dtype.itemsize
                           + tgt_p.size * 4
                           + num_tiles * 8 * 128 * 4),
    )

    partials = pl.pallas_call(
        _make_loss_kernel(float(entropy_lambda), B, tb),
        out_shape=jax.ShapeDtypeStruct((num_tiles, 8, 128), jnp.float32),
        grid=(num_tiles,),
        in_specs=[
            pl.BlockSpec((tb, C), lambda i: (i, 0)),   # preds (native dtype, cast in-kernel)
            pl.BlockSpec((tb, 1), lambda i: (i, 0)),   # targets, int32 (no float one-hot)
            pl.BlockSpec((tb, S), lambda i: (i, 0)),   # attention weights (native dtype)
        ],
        out_specs=pl.BlockSpec((1, 8, 128), lambda i: (i, 0, 0)),
        compiler_params=pltpu.CompilerParams(
            dimension_semantics=("parallel",),
            vmem_limit_bytes=vmem_limit,
        ),
        cost_estimate=cost,
    )(preds_p, tgt_p, attn_p)

    # Global-batch mean: divisor stays the true B even when the last tile is padded.
    return jnp.sum(partials[:, 0, 0]) * (1.0 / B)


def _reference(preds, targets, attn, lam=1.0):
    logp = jax.nn.log_softmax(preds.astype(jnp.float32), axis=-1)
    ce = -jnp.mean(jnp.take_along_axis(logp, targets[:, None], axis=-1))
    p = jax.nn.softmax(attn.astype(jnp.float32), axis=-1)
    ent = -jnp.sum(p * jnp.log(p + 1e-9), axis=1)
    return ce + lam * jnp.mean(ent)


if __name__ == "__main__":
    key = jax.random.PRNGKey(0)
    k1, k2, k3 = jax.random.split(key, 3)

    B, C, S = 8, 4, 16  # batch, num classes, attention length
    preds = jax.random.normal(k1, (B, C), jnp.float32)
    targets = jax.random.randint(k2, (B,), 0, C, dtype=jnp.int32)
    attention_weights = jax.random.normal(k3, (B, S), jnp.float32)

    loss = attention_entropy_min_ce_loss(preds, targets, attention_weights, entropy_lambda=1.0)
    loss = jax.block_until_ready(loss)

    ref = _reference(preds, targets, attention_weights, lam=1.0)
    assert jnp.allclose(loss, ref, rtol=1e-5, atol=1e-5), (loss, ref)
    print("KERNEL_OK")
</pallas_src>

<mosaic_0001>
module attributes {stable_mosaic.version = 11 : i64} {
  func.func @kernel(%arg0: i32, %arg1: memref<8x4xf32, #tpu.memory_space<vmem>>, %arg2: memref<8x1xi32, #tpu.memory_space<vmem>>, %arg3: memref<8x16xf32, #tpu.memory_space<vmem>>, %arg4: memref<1x8x128xf32, #tpu.memory_space<vmem>>) attributes {dimension_semantics = [#tpu.dimension_semantics<parallel>], iteration_bounds = array<i64: 1>, scalar_prefetch = 0 : i64, scratch_operands = 0 : i64, tpu.core_type = #tpu.core_type<tc>, window_params = [{transform_indices = @transform_0, window_bounds = array<i64: 8, 4>}, {transform_indices = @transform_1, window_bounds = array<i64: 8, 1>}, {transform_indices = @transform_2, window_bounds = array<i64: 8, 16>}, {transform_indices = @transform_3, window_bounds = array<i64: 1, 8, 128>}]} {
    %c0 = arith.constant 0 : index
    %c0_0 = arith.constant 0 : index
    %0 = vector.load %arg1[%c0, %c0_0] : memref<8x4xf32, #tpu.memory_space<vmem>>, vector<8x4xf32>
    %c0_1 = arith.constant 0 : index
    %c0_2 = arith.constant 0 : index
    %1 = vector.load %arg2[%c0_1, %c0_2] : memref<8x1xi32, #tpu.memory_space<vmem>>, vector<8x1xi32>
    %c0_3 = arith.constant 0 : index
    %c0_4 = arith.constant 0 : index
    %2 = vector.load %arg3[%c0_3, %c0_4] : memref<8x16xf32, #tpu.memory_space<vmem>>, vector<8x16xf32>
    %c8_i32 = arith.constant 8 : i32
    %3 = arith.muli %arg0, %c8_i32 : i32
    %4 = tpu.iota {dimensions = array<i32: 0>} : vector<8x1xi32>
    %5 = vector.broadcast %3 : i32 to vector<8x1xi32>
    %6 = arith.addi %5, %4 : vector<8x1xi32>
    %c8_i32_5 = arith.constant 8 : i32
    %7 = vector.broadcast %c8_i32_5 : i32 to vector<8x1xi32>
    %8 = arith.cmpi slt, %6, %7 : vector<8x1xi32>
    %9 = arith.extui %8 : vector<8x1xi1> to vector<8x1xi32>
    %10 = arith.sitofp %9 : vector<8x1xi32> to vector<8x1xf32>
    %cst = arith.constant dense<0xFF800000> : vector<8xf32>
    %11 = vector.multi_reduction <maximumf>, %0, %cst [1] : vector<8x4xf32> to vector<8xf32>
    %12 = vector.shape_cast %11 : vector<8xf32> to vector<8x1xf32>
    %13 = vector.broadcast %12 : vector<8x1xf32> to vector<8x4xf32>
    %14 = arith.subf %0, %13 : vector<8x4xf32>
    %15 = math.exp %14 : vector<8x4xf32>
    %cst_6 = arith.constant dense<0.000000e+00> : vector<8xf32>
    %16 = vector.multi_reduction <add>, %15, %cst_6 [1] : vector<8x4xf32> to vector<8xf32>
    %17 = vector.shape_cast %16 : vector<8xf32> to vector<8x1xf32>
    %18 = math.log %17 : vector<8x1xf32>
    %19 = arith.addf %18, %12 : vector<8x1xf32>
    %20 = tpu.iota {dimensions = array<i32: 1>} : vector<8x4xi32>
    %21 = vector.broadcast %1 : vector<8x1xi32> to vector<8x4xi32>
    %22 = arith.cmpi eq, %20, %21 : vector<8x4xi32>
    %cst_7 = arith.constant 0.000000e+00 : f32
    %23 = vector.broadcast %cst_7 : f32 to vector<8x4xf32>
    %24 = arith.select %22, %0, %23 : vector<8x4xi1>, vector<8x4xf32>
    %cst_8 = arith.constant dense<0.000000e+00> : vector<8xf32>
    %25 = vector.multi_reduction <add>, %24, %cst_8 [1] : vector<8x4xf32> to vector<8xf32>
    %26 = vector.shape_cast %25 : vector<8xf32> to vector<8x1xf32>
    %27 = arith.subf %19, %26 : vector<8x1xf32>
    %cst_9 = arith.constant dense<0xFF800000> : vector<8xf32>
    %28 = vector.multi_reduction <maximumf>, %2, %cst_9 [1] : vector<8x16xf32> to vector<8xf32>
    %29 = vector.shape_cast %28 : vector<8xf32> to vector<8x1xf32>
    %30 = vector.broadcast %29 : vector<8x1xf32> to vector<8x16xf32>
    %31 = arith.subf %2, %30 : vector<8x16xf32>
    %32 = math.exp %31 : vector<8x16xf32>
    %cst_10 = arith.constant dense<0.000000e+00> : vector<8xf32>
    %33 = vector.multi_reduction <add>, %32, %cst_10 [1] : vector<8x16xf32> to vector<8xf32>
    %34 = vector.shape_cast %33 : vector<8xf32> to vector<8x1xf32>
    %35 = arith.mulf %32, %2 : vector<8x16xf32>
    %cst_11 = arith.constant dense<0.000000e+00> : vector<8xf32>
    %36 = vector.multi_reduction <add>, %35, %cst_11 [1] : vector<8x16xf32> to vector<8xf32>
    %37 = vector.shape_cast %36 : vector<8xf32> to vector<8x1xf32>
    %38 = math.log %34 : vector<8x1xf32>
    %39 = arith.addf %29, %38 : vector<8x1xf32>
    %40 = tpu.reciprocal %34 : vector<8x1xf32> -> vector<8x1xf32>
    %41 = arith.mulf %37, %40 : vector<8x1xf32>
    %42 = arith.subf %39, %41 : vector<8x1xf32>
    %cst_12 = arith.constant 1.000000e+00 : f32
    %43 = vector.broadcast %cst_12 : f32 to vector<8x1xf32>
    %44 = arith.mulf %43, %42 : vector<8x1xf32>
    %45 = arith.addf %27, %44 : vector<8x1xf32>
    %46 = arith.mulf %10, %45 : vector<8x1xf32>
    %47 = vector.shape_cast %46 : vector<8x1xf32> to vector<1x8x1xf32>
    %cst_13 = arith.constant dense<0.000000e+00> : vector<1xf32>
    %48 = vector.multi_reduction <add>, %47, %cst_13 [1, 2] : vector<1x8x1xf32> to vector<1xf32>
    %49 = vector.shape_cast %48 : vector<1xf32> to vector<1x1x1xf32>
    %50 = vector.extract %49[0, 0, 0] : f32 from vector<1x1x1xf32>
    %51 = vector.broadcast %50 : f32 to vector<1x8x128xf32>
    %c0_14 = arith.constant 0 : index
    %c0_15 = arith.constant 0 : index
    %c0_16 = arith.constant 0 : index
    %52 = vector.load %arg4[%c0_14, %c0_15, %c0_16] : memref<1x8x128xf32, #tpu.memory_space<vmem>>, vector<1x8x128xf32>
    tpu.vector_store %arg4[%c0_14, %c0_15, %c0_16], %51 {strides = array<i32>} : memref<1x8x128xf32, #tpu.memory_space<vmem>>, vector<1x8x128xf32>,
    return
  }
  func.func @transform_0(%arg0: i32) -> (i32, i32) {
    %c0_i32 = arith.constant 0 : i32
    %c0_i32_0 = arith.constant 0 : i32
    return %arg0, %c0_i32 : i32, i32
  }
  func.func @transform_1(%arg0: i32) -> (i32, i32) {
    %c0_i32 = arith.constant 0 : i32
    %c0_i32_0 = arith.constant 0 : i32
    return %arg0, %c0_i32 : i32, i32
  }
  func.func @transform_2(%arg0: i32) -> (i32, i32) {
    %c0_i32 = arith.constant 0 : i32
    %c0_i32_0 = arith.constant 0 : i32
    return %arg0, %c0_i32 : i32, i32
  }
  func.func @transform_3(%arg0: i32) -> (i32, i32, i32) {
    %c0_i32 = arith.constant 0 : i32
    %c0_i32_0 = arith.constant 0 : i32
    %c0_i32_1 = arith.constant 0 : i32
    return %arg0, %c0_i32, %c0_i32_0 : i32, i32, i32
  }
}

</mosaic_0001>

<bundles_post_ra>
// kernel: tpu_custom_call.1
= control target key start
LH: loop header
LB: loop body
LE: loop exit
PB: predicated region body
PF: predicated region fallthrough
CT: control target
= control target key end

     0   :  { %vm26_vm0 = vcmask 31744   ;;  %vm50_vm1 = vcmask 130048   ;;  %v139_v4 = vmov 0   ;;  %s188_s0 = inlined_call_operand.vmem [shape: f32[8,4], index: 0, kind: input, shape index: {}]   ;;  %s189_s1 = inlined_call_operand.vmem [shape: s32[8,1], index: 1, kind: input, shape index: {}]   ;;  %s190_s2 = inlined_call_operand.vmem [shape: f32[8,16], index: 2, kind: input, shape index: {}]   ;;  %s191_s3 = inlined_call_operand.hbm [shape: f32[1,8,128], index: 3, kind: output, shape index: {}]  }
   0x1   :  { %v15_v0 = vld [vmem:[%s188_s0] sm:$0xff]  ;;  %103 = vset.pattern.permute.xlu1 %v139_v4  ;;  %104 = vset.pattern.permute.xlu0 %v139_v4 }
   0x2   :  { %v17_v1 = vld [vmem:[%s190_s2] sm:$0xff]  ;;  %v27_v3 = vsel %vm26_vm0, %v15_v0, -inf }
   0x3   :  { %v16_v2 = vld [vmem:[%s189_s1] sm:$0xff] }
   0x4   :  { %8 = vsyncpa [#allocation3], 0  ;;  %28 = vmax.xlane.f32.xlu0 %v27_v3  ;;  %42 = vperm.xlu1 %103, %v16_v2   ;;  %v51_v5 = vsel %vm50_vm1, %v17_v1, -inf  ;;  %v39_v12 = vlaneseq  ;;  %vm72_vm3 = vcmask 7168   ;;  %s140_s0 = smov [#allocation2]  }
   0x5   :  { %s91_s1 = sshll.u32 %s140_s0, 4  ;;  %s92_s1 = int_to_ptr.vmem [resolvable:$true] %s91_s1 }
   0x6   :  { %v40_v15 = vand.u32 127, %v39_v12  ;;  %s115_s18 = scalar_lea.vmem %s92_s1, 128  ;;  %p120_p1 = scmp.lt.s32.totalorder %s92_s1, %s92_s1 }
   0x7   :  { %p116_p0 = scmp.ne.s32.totalorder %s92_s1, %s115_s18  ;;  %p121_p2 = scmp.lt.s32.totalorder %s115_s18, %s115_s18 }
   0x8   :  { %52 = vmax.xlane.f32.xlu0 %v51_v5 }
   0x9   :  { %p122_p3 = por %p121_p2, %p120_p1 }
   0xb   :  { %p123_p4 = pnand %p122_p3, %p116_p0 }
  0x83   :  { %v43_v16 = vpop.permute.xlu1 %42 }
  0x84   :  { %vm44_vm2 = vcmp.eq.s32.totalorder %v40_v15, %v43_v16 }
  0x85   :  { %v45_v20 = vsel %vm44_vm2, %v15_v0, 0.0 }
  0x86   :  { %v46_v22 = vsel %vm26_vm0, %v45_v20, 0.0 }
  0x91   :  { %v29_v6 = vpop.xlane.xlu0 %28 }
  0x92   :  { %v30_v7 = vsub.f32 %v15_v0, %v29_v6 }
  0x94   :  { %v31_v8 = vmul.f32 1.442695, %v30_v7 }
  0x95   :  { %v53_v9 = vpop.xlane.xlu0 %52 }
  0x96   :  { %105 = vpow2.f32 %v31_v8  ;;  %v54_v10 = vsub.f32 %v17_v1, %v53_v9 }
  0x98   :  { %v55_v11 = vmul.f32 1.442695, %v54_v10 }
  0x9a   :  { %107 = vpow2.f32 %v55_v11 }
  0xa0   :  { %v106_v13 = vpop.eup %105 }
  0xa1   :  { %v33_v14 = vsel %vm26_vm0, %v106_v13, 0.0 }
  0xa2   :  { %34 = vadd.xlane.f32.xlu1 %v33_v14 }
  0xa4   :  { %v108_v17 = vpop.eup %107 }
  0xa5   :  { %v57_v18 = vsel %vm50_vm1, %v108_v17, 0.0  ;;  %v60_v19 = vmul.f32 %v108_v17, %v17_v1 }
  0xa6   :  { %58 = vadd.xlane.f32.xlu0 %v57_v18 }
  0xa7   :  { %v61_v21 = vsel %vm50_vm1, %v60_v19, 0.0 }
  0xaa   :  { %62 = vadd.xlane.f32.xlu0 %v61_v21 }
  0xae   :  { %47 = vadd.xlane.f32.xlu0 %v46_v22 }
 0x12f   :  { %v35_v23 = vpop.xlane.xlu1 %34 }
 0x130   :  { %109 = vlog2.f32 %v35_v23 }
 0x133   :  { %v59_v24 = vpop.xlane.xlu0 %58 }
 0x134   :  { %111 = vlog2.f32 %v59_v24 }
 0x135   :  { %113 = vrcp.f32 %v59_v24 }
 0x137   :  { %v63_v27 = vpop.xlane.xlu0 %62 }
 0x13a   :  { %v110_v25 = vpop.eup %109 }
 0x13b   :  { %v37_v26 = vmul.f32 0.6931472, %v110_v25  ;;  %v48_v32 = vpop.xlane.xlu0 %47 }
 0x13d   :  { %v38_v31 = vadd.f32 %v37_v26, %v29_v6 }
 0x13e   :  { %v112_v28 = vpop.eup %111 }
 0x13f   :  { %v114_v29 = vpop.eup %113  ;;  %v65_v30 = vmul.f32 0.6931472, %v112_v28  ;;  %v49_v36 = vsub.f32 %v38_v31, %v48_v32 }
 0x140   :  { %v68_v34 = vmul.f32 %v114_v29, %v63_v27 }
 0x141   :  { %v66_v33 = vadd.f32 %v65_v30, %v53_v9 }
 0x143   :  { %v69_v35 = vsub.f32 %v66_v33, %v68_v34 }
 0x145   :  { %v70_v37 = vadd.f32 %v69_v35, %v49_v36 }
 0x147   :  { %v73_v38 = vsel %vm72_vm3, %v70_v37, 0.0 }
 0x148   :  { %74 = vadd.xlane.f32.xlu0 %v73_v38 }
 0x1d5   :  { %v75_v39 = vpop.xlane.xlu0 %74 }
 0x1d6   :  { %v76_v40 = vrot.slane %v75_v39, 4 }
 0x1d8   :  { %v77_v41 = vadd.f32 %v76_v40, %v75_v39 }
 0x1da   :  { %v78_v42 = vrot.slane %v77_v41, 2 }
 0x1dc   :  { %v79_v43 = vadd.f32 %v78_v42, %v77_v41 }
 0x1de   :  { %v80_v44 = vrot.slane %v79_v43, 1 }
 0x1e0   :  { %v81_v45 = vadd.f32 %v80_v44, %v79_v43 }
 0x1e2   :  { %99 = vpush %v81_v45 }
 0x213   :  { %s100_s2 = spop %99 }
 0x214   :  { %v83_v46 = vstv %s100_s2 }
 0x215   :  { %84 = vst [vmem:[#allocation2] sm:$0xff] %v83_v46 }
 0x216   :  { %126 = shalt.err (!%p123_p4)
}
 0x217   :  { %s127_s21 = scalar_lea.hbm %s191_s3, 128 }
 0x218   :  { %p128_p5 = scmp.ne.s32.totalorder %s191_s3, %s127_s21  ;;  %p131_p6 = scmp.lt.u32.totalorder %s127_s21, %s191_s3 }
 0x21a   :  { %p133_p7 = pnand %p131_p6, %p128_p5 }
 0x21c   :  { %136 = shalt.err (!%p133_p7)
}
 0x21d   :  { %94 = dma.vmem_to_hbm [thread:$0]  %s92_s1, 128, %s191_s3, [#allocation3]  }
 0x21e   :  { %137 = dma.done.wait [#allocation3], 128  }
 0x21f   :  { %138 = vsyncadd [#allocation3], 4294967168 }
 0x220   :  { %98 = vsyncpa [#allocation3], 1 }

</bundles_post_ra>
